<compile_context>
chip_gen: v6e
topology: v6e:2x2x1
jax: 0.10.0
libtpu: 0.0.40
codegen_flags: <defaults>
</compile_context>

<pallas_src>
import jax
import jax.numpy as jnp
from jax.experimental import pallas as pl
from jax.experimental.pallas import tpu as pltpu

_LANES = 128
_TARGET_BLOCK_BYTES = 4 << 20      # ~4 MiB per input per pipeline buffer
_SMALL_TOTAL = 1 << 16             # below this, plain fused XLA reduce wins
_VMEM_LIMIT_FLOOR = 40 << 20
_VMEM_LIMIT_CAP = 56 << 20         # stays under v7x's 64 MiB physical VMEM


def _cdiv(a, b):
    return -(-a // b)


def _round_up(a, b):
    return _cdiv(a, b) * b


def _num_core_splits():
    """Return 2 only on multi-TensorCore chips (v7x); 1 on v5e/v6e."""
    try:
        info = pltpu.get_tpu_info()
    except Exception:
        return 1
    for name in ("num_cores", "cores_per_chip", "num_tensorcores",
                 "tensorcores_per_chip", "core_count"):
        n = getattr(info, name, None)
        if n is not None:
            try:
                if int(n) > 1:
                    return 2
            except (TypeError, ValueError):
                pass
    ver = getattr(info, "chip_version", None)
    if ver is not None and "7" in str(ver):
        return 2
    return 1


def _make_sumsq_kernel(red_axis):
    def kernel(x1_ref, x2_ref, out_ref, acc_ref):
        @pl.when(pl.program_id(red_axis) == 0)
        def _init():
            acc_ref[...] = jnp.zeros_like(acc_ref)

        d = x2_ref[...].astype(jnp.float32) - x1_ref[...].astype(jnp.float32)
        # Lane-parallel partial: only a cross-sublane reduce per step; the
        # cross-lane reduce happens once, in the finalize branch.
        acc_ref[...] += jnp.sum(d * d, axis=0, keepdims=True)

        @pl.when(pl.program_id(red_axis) == pl.num_programs(red_axis) - 1)
        def _finalize():
            out_ref[...] = jnp.broadcast_to(jnp.sum(acc_ref[...]), out_ref.shape)

    return kernel


def _pallas_sumsq(x1, x2, n_tiles, tile_r, splits):
    """sum((x2 - x1)**2) over rows [0, n_tiles * tile_r) of the 2-D inputs."""
    _, C = x1.shape
    itemsize = jnp.dtype(x1.dtype).itemsize
    tile_bytes = tile_r * _round_up(C, _LANES) * itemsize
    vmem_limit = int(min(_VMEM_LIMIT_CAP,
                         max(_VMEM_LIMIT_FLOOR, 6 * tile_bytes)))

    if splits > 1:
        tiles_per_split = n_tiles // splits
        grid = (splits, tiles_per_split)
        in_map = lambda c, i: (c * tiles_per_split + i, 0)
        out_map = lambda c, i: (c, 0)
        core_parallel = getattr(pltpu, "CORE_PARALLEL", None)
        if core_parallel is not None:
            semantics = (core_parallel, pltpu.ARBITRARY)
        else:
            semantics = ("parallel", "arbitrary")
        red_axis = 1
    else:
        grid = (n_tiles,)
        in_map = lambda i: (i, 0)
        out_map = lambda i: (0, 0)
        semantics = (pltpu.ARBITRARY,)
        red_axis = 0

    # TODO(synk): optionally sweep pipeline_mode=pl.Buffered(3) on v7x if the
    # trace shows exposed DMA starts.
    data_spec = pl.BlockSpec((tile_r, C), in_map)

    partials = pl.pallas_call(
        _make_sumsq_kernel(red_axis),
        out_shape=jax.ShapeDtypeStruct((splits * 8, _LANES), jnp.float32),
        grid=grid,
        in_specs=[data_spec, data_spec],
        out_specs=pl.BlockSpec((8, _LANES), out_map),
        scratch_shapes=[pltpu.VMEM((1, C), jnp.float32)],
        compiler_params=pltpu.CompilerParams(
            dimension_semantics=semantics,
            vmem_limit_bytes=vmem_limit),
    )(x1, x2)

    # Each split duplicated its scalar partial across its own (8, 128) block.
    return jnp.sum(partials[0::8, 0])


def _sum_sq_diff(output1, output2):
    """sum over ALL elements of (output2 - output1)**2, accumulated in f32."""
    assert output1.shape == output2.shape
    total = 1
    for s in output1.shape:
        total *= int(s)

    # Tiny-input fast path: fixed Pallas per-call cost dominates here.
    if total <= _SMALL_TOTAL:
        d = output2.astype(jnp.float32) - output1.astype(jnp.float32)
        return jnp.sum(d * d)

    # Collapse to 2-D (rows, last_dim).  For the usual 2-D embeddings this is
    # the identity (zero-copy); inputs stream straight out of HBM.
    C = int(output1.shape[-1])
    R = total // C
    x1 = output1.reshape(R, C)
    x2 = output2.reshape(R, C)

    itemsize = jnp.dtype(output1.dtype).itemsize
    bytes_per_row = _round_up(C, _LANES) * itemsize
    r8 = (R // 8) * 8
    splits = _num_core_splits()

    rows_main = 0
    main_sum = jnp.float32(0.0)
    if r8 >= 8:
        # Byte-based tile sizing: ~4 MiB per input block (bf16 gets 2x rows).
        n_tiles = max(1, _cdiv(r8 * bytes_per_row, _TARGET_BLOCK_BYTES))
        n_tiles = min(n_tiles, r8 // 8)
        if splits > 1:
            if n_tiles >= splits:
                n_tiles = (n_tiles // splits) * splits
            else:
                splits = 1
        tile_r = max(8, ((r8 // n_tiles) // 8) * 8)   # multiple of 8, fits r8
        rows_main = n_tiles * tile_r                  # <= R, no padding needed
        main_sum = _pallas_sumsq(x1, x2, n_tiles, tile_r, splits)

    # Ragged tail rows (tiny fraction of the data): fused XLA reduce, zero-copy.
    if rows_main < R:
        t1 = x1[rows_main:, :].astype(jnp.float32)
        t2 = x2[rows_main:, :].astype(jnp.float32)
        main_sum = main_sum + jnp.sum((t2 - t1) ** 2)
    return main_sum


def contrastive_loss(output1, output2, target, *, margin, eps=1e-9,
                     size_average=True):
    """Pallas TPU implementation of ContrastiveLoss.forward."""
    assert output1.ndim >= 2, "ContrastiveLoss expects rank >= 2 embeddings"

    sum_sq = _sum_sq_diff(output1, output2)           # heavy HBM-bound part

    # distances == (o2-o1).pow(2).sum(1).mean(): mean over every dim but dim 1.
    denom = 1
    for ax, s in enumerate(output1.shape):
        if ax != 1:
            denom *= int(s)
    distances = sum_sq / denom

    t = target.astype(jnp.float32)
    hinge = jnp.maximum(jnp.float32(margin) - jnp.sqrt(distances + eps), 0.0)
    losses = 0.5 * (t * distances + (1.0 - t) * hinge * hinge)
    return jnp.mean(losses) if size_average else jnp.sum(losses)


def _reference(output1, output2, target, *, margin, eps=1e-9,
               size_average=True):
    # Pure-JAX reference mirroring the PyTorch code (f32 math).
    o1 = output1.astype(jnp.float32)
    o2 = output2.astype(jnp.float32)
    distances = jnp.mean(jnp.sum((o2 - o1) ** 2, axis=1))
    t = target.astype(jnp.float32)
    hinge = jax.nn.relu(margin - jnp.sqrt(distances + eps))
    losses = 0.5 * (t * distances + (1.0 - t) * hinge ** 2)
    return jnp.mean(losses) if size_average else jnp.sum(losses)


if __name__ == "__main__":
    MARGIN = 1.0  # deterministic "parameter" from __init__(margin)

    key = jax.random.PRNGKey(0)
    k1, k2, k3, k4, k5, k6, k7, k8, k9 = jax.random.split(key, 9)

    # 1) Small shapes consistent with the module (fast path + epilogue check).
    B, D = 8, 32
    o1 = jax.random.normal(k1, (B, D), dtype=jnp.float32)
    o2 = jax.random.normal(k2, (B, D), dtype=jnp.float32)
    tgt = jax.random.bernoulli(k3, 0.5, (B,)).astype(jnp.int32)

    loss = jax.block_until_ready(contrastive_loss(o1, o2, tgt, margin=MARGIN))
    ref = _reference(o1, o2, tgt, margin=MARGIN)
    assert jnp.allclose(loss, ref, rtol=1e-5, atol=1e-6), (loss, ref)

    loss_s = jax.block_until_ready(
        contrastive_loss(o1, o2, tgt, margin=MARGIN, size_average=False))
    ref_s = _reference(o1, o2, tgt, margin=MARGIN, size_average=False)
    assert jnp.allclose(loss_s, ref_s, rtol=1e-5, atol=1e-6), (loss_s, ref_s)

    # 2) Ragged shapes (not multiples of 8/128) -> Pallas kernel + tail path.
    B2, D2 = 600, 220
    o1b = jax.random.normal(k4, (B2, D2), dtype=jnp.float32)
    o2b = jax.random.normal(k5, (B2, D2), dtype=jnp.float32)
    tgtb = jax.random.bernoulli(k6, 0.5, (B2,)).astype(jnp.int32)
    loss_b = jax.block_until_ready(contrastive_loss(o1b, o2b, tgtb, margin=MARGIN))
    ref_b = _reference(o1b, o2b, tgtb, margin=MARGIN)
    assert jnp.allclose(loss_b, ref_b, rtol=1e-4, atol=1e-5), (loss_b, ref_b)

    # 3) Lane-aligned multi-tile case -> multi-step accumulator in the kernel.
    B3, D3 = 4096, 512
    o1c = jax.random.normal(k7, (B3, D3), dtype=jnp.float32)
    o2c = jax.random.normal(k8, (B3, D3), dtype=jnp.float32)
    tgtc = jax.random.bernoulli(k9, 0.5, (B3,)).astype(jnp.int32)
    loss_c = jax.block_until_ready(contrastive_loss(o1c, o2c, tgtc, margin=MARGIN))
    ref_c = _reference(o1c, o2c, tgtc, margin=MARGIN)
    assert jnp.allclose(loss_c, ref_c, rtol=1e-4, atol=1e-5), (loss_c, ref_c)

    # 4) bf16 inputs -> bytes-based tile sizing + in-kernel upcast.
    o1d = o1c.astype(jnp.bfloat16)
    o2d = o2c.astype(jnp.bfloat16)
    loss_d = jax.block_until_ready(contrastive_loss(o1d, o2d, tgtc, margin=MARGIN))
    ref_d = _reference(o1d, o2d, tgtc, margin=MARGIN)
    assert jnp.allclose(loss_d, ref_d, rtol=1e-3, atol=1e-4), (loss_d, ref_d)

    print("KERNEL_OK")
</pallas_src>

<mosaic_0001>
module attributes {stable_mosaic.version = 11 : i64} {
  func.func @kernel(%arg0: i32, %arg1: memref<600x220xf32, #tpu.memory_space<vmem>>, %arg2: memref<600x220xf32, #tpu.memory_space<vmem>>, %arg3: memref<8x128xf32, #tpu.memory_space<vmem>>, %arg4: memref<1x220xf32, #tpu.memory_space<vmem>>) attributes {dimension_semantics = [#tpu.dimension_semantics<arbitrary>], iteration_bounds = array<i64: 1>, scalar_prefetch = 0 : i64, scratch_operands = 1 : i64, tpu.core_type = #tpu.core_type<tc>, window_params = [{transform_indices = @transform_0, window_bounds = array<i64: 600, 220>}, {transform_indices = @transform_1, window_bounds = array<i64: 600, 220>}, {pipeline_mode = #tpu.pipeline_mode<synchronous>, transform_indices = @transform_2, window_bounds = array<i64: 8, 128>}]} {
    %c0_i32 = arith.constant 0 : i32
    %0 = arith.cmpi eq, %arg0, %c0_i32 : i32
    %1 = arith.extui %0 : i1 to i32
    %c0_i32_0 = arith.constant 0 : i32
    %2 = arith.cmpi ne, %1, %c0_i32_0 : i32
    scf.if %2 {
      %cst_10 = arith.constant 0.000000e+00 : f32
      %15 = vector.broadcast %cst_10 : f32 to vector<1x220xf32>
      %c0_11 = arith.constant 0 : index
      %c0_12 = arith.constant 0 : index
      %16 = vector.load %arg4[%c0_11, %c0_12] : memref<1x220xf32, #tpu.memory_space<vmem>>, vector<1x220xf32>
      tpu.vector_store %arg4[%c0_11, %c0_12], %15 {strides = array<i32>} : memref<1x220xf32, #tpu.memory_space<vmem>>, vector<1x220xf32>,
    } else {
    }
    %c0 = arith.constant 0 : index
    %c0_1 = arith.constant 0 : index
    %3 = vector.load %arg2[%c0, %c0_1] : memref<600x220xf32, #tpu.memory_space<vmem>>, vector<600x220xf32>
    %c0_2 = arith.constant 0 : index
    %c0_3 = arith.constant 0 : index
    %4 = vector.load %arg1[%c0_2, %c0_3] : memref<600x220xf32, #tpu.memory_space<vmem>>, vector<600x220xf32>
    %5 = arith.subf %3, %4 : vector<600x220xf32>
    %c0_4 = arith.constant 0 : index
    %c0_5 = arith.constant 0 : index
    %6 = vector.load %arg4[%c0_4, %c0_5] : memref<1x220xf32, #tpu.memory_space<vmem>>, vector<1x220xf32>
    %7 = arith.mulf %5, %5 : vector<600x220xf32>
    %cst = arith.constant dense<0.000000e+00> : vector<220xf32>
    %8 = vector.multi_reduction <add>, %7, %cst [0] : vector<600x220xf32> to vector<220xf32>
    %9 = vector.shape_cast %8 : vector<220xf32> to vector<1x220xf32>
    %10 = arith.addf %6, %9 : vector<1x220xf32>
    %c0_6 = arith.constant 0 : index
    %c0_7 = arith.constant 0 : index
    %11 = vector.load %arg4[%c0_6, %c0_7] : memref<1x220xf32, #tpu.memory_space<vmem>>, vector<1x220xf32>
    tpu.vector_store %arg4[%c0_6, %c0_7], %10 {strides = array<i32>} : memref<1x220xf32, #tpu.memory_space<vmem>>, vector<1x220xf32>,
    %c0_i32_8 = arith.constant 0 : i32
    %12 = arith.cmpi eq, %arg0, %c0_i32_8 : i32
    %13 = arith.extui %12 : i1 to i32
    %c0_i32_9 = arith.constant 0 : i32
    %14 = arith.cmpi ne, %13, %c0_i32_9 : i32
    scf.if %14 {
      %c0_10 = arith.constant 0 : index
      %c0_11 = arith.constant 0 : index
      %15 = vector.load %arg4[%c0_10, %c0_11] : memref<1x220xf32, #tpu.memory_space<vmem>>, vector<1x220xf32>
      %16 = vector.shape_cast %15 : vector<1x220xf32> to vector<1x1x220xf32>
      %cst_12 = arith.constant dense<0.000000e+00> : vector<1xf32>
      %17 = vector.multi_reduction <add>, %16, %cst_12 [1, 2] : vector<1x1x220xf32> to vector<1xf32>
      %18 = vector.shape_cast %17 : vector<1xf32> to vector<1x1x1xf32>
      %19 = vector.extract %18[0, 0, 0] : f32 from vector<1x1x1xf32>
      %20 = vector.broadcast %19 : f32 to vector<8x128xf32>
      %c0_13 = arith.constant 0 : index
      %c0_14 = arith.constant 0 : index
      %21 = vector.load %arg3[%c0_13, %c0_14] : memref<8x128xf32, #tpu.memory_space<vmem>>, vector<8x128xf32>
      tpu.vector_store %arg3[%c0_13, %c0_14], %20 {strides = array<i32>} : memref<8x128xf32, #tpu.memory_space<vmem>>, vector<8x128xf32>,
    } else {
    }
    return
  }
  func.func @transform_0(%arg0: i32) -> (i32, i32) {
    %c0_i32 = arith.constant 0 : i32
    %c0_i32_0 = arith.constant 0 : i32
    return %arg0, %c0_i32 : i32, i32
  }
  func.func @transform_1(%arg0: i32) -> (i32, i32) {
    %c0_i32 = arith.constant 0 : i32
    %c0_i32_0 = arith.constant 0 : i32
    return %arg0, %c0_i32 : i32, i32
  }
  func.func @transform_2(%arg0: i32) -> (i32, i32) {
    %c0_i32 = arith.constant 0 : i32
    %c0_i32_0 = arith.constant 0 : i32
    %c0_i32_1 = arith.constant 0 : i32
    return %c0_i32, %c0_i32_0 : i32, i32
  }
}

</mosaic_0001>

<bundles_post_ra>
// kernel: tpu_custom_call.1
= control target key start
LH: loop header
LB: loop body
LE: loop exit
PB: predicated region body
PF: predicated region fallthrough
CT: control target
= control target key end

     0   :  { %7 = vsyncpa [#allocation4], 0  ;;  %v16_v0 = vlaneseq  ;;  %v954_v2 = vmov 0.0   ;;  %vm702_vm1 = vcmask 752640   ;;  %vm897_vm2 = vcmask 1040384   ;;  %s1960_s0 = inlined_call_operand.vmem [shape: f32[600,220], index: 0, kind: input, shape index: {}]   ;;  %s1961_s1 = inlined_call_operand.vmem [shape: f32[600,220], index: 1, kind: input, shape index: {}]   ;;  %s1962_s2 = inlined_call_operand.hbm [shape: f32[8,128], index: 2, kind: output, shape index: {}]  }
   0x1   :  { %v21_v3 = vld [vmem:[%s1961_s1] sm:$0xff]  ;;  %v22_v4 = vld [vmem:[%s1961_s1 + $0x8] sm:$0xff]  ;;  %v23_v5 = vld [vmem:[%s1961_s1 + $0x10] sm:$0xff]  ;;  %vm899_vm3 = vcmask 745472  }
   0x2   :  { %vm973_vm0 = vcmp.lt.s32.totalorder %v16_v0, 220  ;;  %v24_v6 = vld [vmem:[%s1961_s1 + $0x18] sm:$0xff]  ;;  %v26_v7 = vld [vmem:[%s1961_s1 + $0x28] sm:$0xff]  ;;  %v171_v8 = vld [vmem:[%s1960_s0] sm:$0xff] }
   0x3   :  { %20 = vst.msk [vmem:[#allocation2] sm:$0x3] %vm973_vm0, %v954_v2  ;;  %v173_v9 = vld [vmem:[%s1960_s0 + $0x10] sm:$0xff]  ;;  %v172_v10 = vld [vmem:[%s1960_s0 + $0x8] sm:$0xff]  ;;  %v174_v11 = vld [vmem:[%s1960_s0 + $0x18] sm:$0xff]  ;;  %v321_v17 = vsub.f32 %v21_v3, %v171_v8 }
   0x4   :  { %v176_v12 = vld [vmem:[%s1960_s0 + $0x28] sm:$0xff]  ;;  %v25_v13 = vld [vmem:[%s1961_s1 + $0x20] sm:$0xff]  ;;  %v28_v15 = vld [vmem:[%s1961_s1 + $0x38] sm:$0xff]  ;;  %v323_v18 = vsub.f32 %v23_v5, %v173_v9  ;;  %v322_v21 = vsub.f32 %v22_v4, %v172_v10  ;;  %v324_v22 = vsub.f32 %v24_v6, %v174_v11 }
   0x5   :  { %v175_v14 = vld [vmem:[%s1960_s0 + $0x20] sm:$0xff]  ;;  %v178_v16 = vld [vmem:[%s1960_s0 + $0x38] sm:$0xff]  ;;  %v27_v19 = vld [vmem:[%s1961_s1 + $0x30] sm:$0xff]  ;;  %v326_v23 = vsub.f32 %v26_v7, %v176_v12  ;;  %v472_v34 = vmul.f32 %v321_v17, %v321_v17 }
   0x6   :  { %v177_v20 = vld [vmem:[%s1960_s0 + $0x30] sm:$0xff]  ;;  %v30_v24 = vld [vmem:[%s1961_s1 + $0x48] sm:$0xff]  ;;  %v325_v26 = vsub.f32 %v25_v13, %v175_v14  ;;  %v29_v27 = vld [vmem:[%s1961_s1 + $0x40] sm:$0xff]  ;;  %v328_v29 = vsub.f32 %v28_v15, %v178_v16  ;;  %v474_v35 = vmul.f32 %v323_v18, %v323_v18  ;;  %v473_v40 = vmul.f32 %v322_v21, %v322_v21 }
   0x7   :  { %v180_v25 = vld [vmem:[%s1960_s0 + $0x48] sm:$0xff]  ;;  %v179_v28 = vld [vmem:[%s1960_s0 + $0x40] sm:$0xff]  ;;  %v31_v30 = vld [vmem:[%s1961_s1 + $0x50] sm:$0xff]  ;;  %v327_v33 = vsub.f32 %v27_v19, %v177_v20  ;;  %v475_v41 = vmul.f32 %v324_v22, %v324_v22  ;;  %v477_v42 = vmul.f32 %v326_v23, %v326_v23 }
   0x8   :  { %v32_v31 = vld [vmem:[%s1961_s1 + $0x58] sm:$0xff]  ;;  %v34_v36 = vld [vmem:[%s1961_s1 + $0x68] sm:$0xff]  ;;  %v181_v37 = vld [vmem:[%s1960_s0 + $0x50] sm:$0xff]  ;;  %v330_v39 = vsub.f32 %v30_v24, %v180_v25  ;;  %v329_v43 = vsub.f32 %v29_v27, %v179_v28  ;;  %v476_v44 = vmul.f32 %v325_v26, %v325_v26  ;;  %v479_v48 = vmul.f32 %v328_v29, %v328_v29 }
   0x9   :  { %v182_v32 = vld [vmem:[%s1960_s0 + $0x58] sm:$0xff]  ;;  %v184_v38 = vld [vmem:[%s1960_s0 + $0x68] sm:$0xff]  ;;  %v33_v45 = vld [vmem:[%s1961_s1 + $0x60] sm:$0xff]  ;;  %v331_v51 = vsub.f32 %v31_v30, %v181_v37  ;;  %v478_v53 = vmul.f32 %v327_v33, %v327_v33  ;;  %v622_v54 = vadd.f32 %v474_v35, %v472_v34  ;;  %v703_v58 = vsel %vm702_vm1, %v473_v40, 0.0 }
   0xa   :  { %v183_v46 = vld [vmem:[%s1960_s0 + $0x60] sm:$0xff]  ;;  %v332_v47 = vsub.f32 %v32_v31, %v182_v32  ;;  %v36_v49 = vld [vmem:[%s1961_s1 + $0x78] sm:$0xff]  ;;  %v334_v52 = vsub.f32 %v34_v36, %v184_v38  ;;  %v35_v55 = vld [vmem:[%s1961_s1 + $0x70] sm:$0xff]  ;;  %v481_v57 = vmul.f32 %v330_v39, %v330_v39  ;;  %v704_v59 = vsel %vm702_vm1, %v475_v41, 0.0 }
   0xb   :  { %v186_v50 = vld [vmem:[%s1960_s0 + $0x78] sm:$0xff]  ;;  %v185_v56 = vld [vmem:[%s1960_s0 + $0x70] sm:$0xff]  ;;  %v706_v60 = vsel %vm702_vm1, %v477_v42, 0.0  ;;  %v38_v61 = vld [vmem:[%s1961_s1 + $0x88] sm:$0xff]  ;;  %v333_v63 = vsub.f32 %v33_v45, %v183_v46  ;;  %v480_v2 = vmul.f32 %v329_v43, %v329_v43  ;;  %v623_v3 = vadd.f32 %v622_v54, %v476_v44 }
   0xc   :  { %v188_v62 = vld [vmem:[%s1960_s0 + $0x88] sm:$0xff]  ;;  %v705_v4 = vadd.f32 %v704_v59, %v703_v58  ;;  %v37_v5 = vld [vmem:[%s1961_s1 + $0x80] sm:$0xff]  ;;  %v336_v7 = vsub.f32 %v36_v49, %v186_v50  ;;  %v483_v8 = vmul.f32 %v332_v47, %v332_v47  ;;  %v708_v9 = vsel %vm702_vm1, %v479_v48, 0.0  ;;  %v40_v10 = vld [vmem:[%s1961_s1 + $0x98] sm:$0xff] }
   0xd   :  { %v187_v6 = vld [vmem:[%s1960_s0 + $0x80] sm:$0xff]  ;;  %v190_v11 = vld [vmem:[%s1960_s0 + $0x98] sm:$0xff]  ;;  %v335_v12 = vsub.f32 %v35_v55, %v185_v56  ;;  %v482_v13 = vmul.f32 %v331_v51, %v331_v51  ;;  %v624_v14 = vadd.f32 %v623_v3, %v478_v53  ;;  %v39_v16 = vld [vmem:[%s1961_s1 + $0x90] sm:$0xff]  ;;  %v338_v18 = vsub.f32 %v38_v61, %v188_v62 }
   0xe   :  { %v707_v15 = vadd.f32 %v706_v60, %v705_v4  ;;  %v189_v17 = vld [vmem:[%s1960_s0 + $0x90] sm:$0xff]  ;;  %v485_v19 = vmul.f32 %v334_v52, %v334_v52  ;;  %v710_v20 = vsel %vm702_vm1, %v481_v57, 0.0  ;;  %v42_v21 = vld [vmem:[%s1961_s1 + $0xa8] sm:$0xff]  ;;  %v337_v23 = vsub.f32 %v37_v5, %v187_v6  ;;  %v41_v27 = vld [vmem:[%s1961_s1 + $0xa0] sm:$0xff] }
   0xf   :  { %v192_v22 = vld [vmem:[%s1960_s0 + $0xa8] sm:$0xff]  ;;  %v484_v24 = vmul.f32 %v333_v63, %v333_v63  ;;  %v625_v25 = vadd.f32 %v624_v14, %v480_v2  ;;  %v191_v28 = vld [vmem:[%s1960_s0 + $0xa0] sm:$0xff]  ;;  %v340_v29 = vsub.f32 %v40_v10, %v190_v11  ;;  %v487_v30 = vmul.f32 %v336_v7, %v336_v7  ;;  %v44_v32 = vld [vmem:[%s1961_s1 + $0xb8] sm:$0xff] }
  0x10   :  { %v709_v26 = vadd.f32 %v708_v9, %v707_v15  ;;  %v712_v31 = vsel %vm702_vm1, %v483_v8, 0.0  ;;  %v194_v33 = vld [vmem:[%s1960_s0 + $0xb8] sm:$0xff]  ;;  %v339_v34 = vsub.f32 %v39_v16, %v189_v17  ;;  %v486_v35 = vmul.f32 %v335_v12, %v335_v12  ;;  %v43_v38 = vld [vmem:[%s1961_s1 + $0xb0] sm:$0xff]  ;;  %v46_v43 = vld [vmem:[%s1961_s1 + $0xc8] sm:$0xff] }
  0x11   :  { %v626_v36 = vadd.f32 %v625_v25, %v482_v13  ;;  %v193_v39 = vld [vmem:[%s1960_s0 + $0xb0] sm:$0xff]  ;;  %v342_v40 = vsub.f32 %v42_v21, %v192_v22  ;;  %v489_v41 = vmul.f32 %v338_v18, %v338_v18  ;;  %v714_v42 = vsel %vm702_vm1, %v485_v19, 0.0  ;;  %v196_v44 = vld [vmem:[%s1960_s0 + $0xc8] sm:$0xff]  ;;  %v45_v49 = vld [vmem:[%s1961_s1 + $0xc0] sm:$0xff] }
  0x12   :  { %v711_v37 = vadd.f32 %v710_v20, %v709_v26  ;;  %v341_v45 = vsub.f32 %v41_v27, %v191_v28  ;;  %v488_v46 = vmul.f32 %v337_v23, %v337_v23  ;;  %v195_v50 = vld [vmem:[%s1960_s0 + $0xc0] sm:$0xff]  ;;  %v344_v51 = vsub.f32 %v44_v32, %v194_v33  ;;  %v48_v54 = vld [vmem:[%s1961_s1 + $0xd8] sm:$0xff]  ;;  %v47_v60 = vld [vmem:[%s1961_s1 + $0xd0] sm:$0xff] }
  0x13   :  { %v627_v47 = vadd.f32 %v626_v36, %v484_v24  ;;  %v491_v52 = vmul.f32 %v340_v29, %v340_v29  ;;  %v716_v53 = vsel %vm702_vm1, %v487_v30, 0.0  ;;  %v198_v55 = vld [vmem:[%s1960_s0 + $0xd8] sm:$0xff]  ;;  %v343_v56 = vsub.f32 %v43_v38, %v193_v39  ;;  %v197_v61 = vld [vmem:[%s1960_s0 + $0xd0] sm:$0xff]  ;;  %v50_v3 = vld [vmem:[%s1961_s1 + $0xe8] sm:$0xff] }
  0x14   :  { %v713_v48 = vadd.f32 %v712_v31, %v711_v37  ;;  %v490_v57 = vmul.f32 %v339_v34, %v339_v34  ;;  %v346_v62 = vsub.f32 %v46_v43, %v196_v44  ;;  %v493_v63 = vmul.f32 %v342_v40, %v342_v40  ;;  %v200_v4 = vld [vmem:[%s1960_s0 + $0xe8] sm:$0xff]  ;;  %v49_v9 = vld [vmem:[%s1961_s1 + $0xe0] sm:$0xff]  ;;  %v52_v14 = vld [vmem:[%s1961_s1 + $0xf8] sm:$0xff] }
  0x15   :  { %v628_v58 = vadd.f32 %v627_v47, %v486_v35  ;;  %v718_v2 = vsel %vm702_vm1, %v489_v41, 0.0  ;;  %v345_v5 = vsub.f32 %v45_v49, %v195_v50  ;;  %v492_v6 = vmul.f32 %v341_v45, %v341_v45  ;;  %v199_v10 = vld [vmem:[%s1960_s0 + $0xe0] sm:$0xff]  ;;  %v202_v15 = vld [vmem:[%s1960_s0 + $0xf8] sm:$0xff]  ;;  %v51_v20 = vld [vmem:[%s1961_s1 + $0xf0] sm:$0xff] }
  0x16   :  { %v715_v59 = vadd.f32 %v714_v42, %v713_v48  ;;  %v348_v11 = vsub.f32 %v48_v54, %v198_v55  ;;  %v495_v12 = vmul.f32 %v344_v51, %v344_v51  ;;  %v720_v13 = vsel %vm702_vm1, %v491_v52, 0.0  ;;  %v201_v21 = vld [vmem:[%s1960_s0 + $0xf0] sm:$0xff]  ;;  %v54_v25 = vld [vmem:[%s1961_s1 + $0x108] sm:$0xff]  ;;  %v53_v31 = vld [vmem:[%s1961_s1 + $0x100] sm:$0xff] }
  0x17   :  { %v629_v7 = vadd.f32 %v628_v58, %v488_v46  ;;  %v347_v16 = vsub.f32 %v47_v60, %v197_v61  ;;  %v494_v17 = vmul.f32 %v343_v56, %v343_v56  ;;  %v350_v22 = vsub.f32 %v50_v3, %v200_v4  ;;  %v204_v26 = vld [vmem:[%s1960_s0 + $0x108] sm:$0xff]  ;;  %v203_v32 = vld [vmem:[%s1960_s0 + $0x100] sm:$0xff]  ;;  %v56_v36 = vld [vmem:[%s1961_s1 + $0x118] sm:$0xff] }
  0x18   :  { %v717_v8 = vadd.f32 %v716_v53, %v715_v59  ;;  %v497_v23 = vmul.f32 %v346_v62, %v346_v62  ;;  %v722_v24 = vsel %vm702_vm1, %v493_v63, 0.0  ;;  %v349_v27 = vsub.f32 %v49_v9, %v199_v10  ;;  %v206_v37 = vld [vmem:[%s1960_s0 + $0x118] sm:$0xff]  ;;  %v55_v42 = vld [vmem:[%s1961_s1 + $0x110] sm:$0xff]  ;;  %v58_v47 = vld [vmem:[%s1961_s1 + $0x128] sm:$0xff] }
  0x19   :  { %v630_v18 = vadd.f32 %v629_v7, %v490_v57  ;;  %v496_v28 = vmul.f32 %v345_v5, %v345_v5  ;;  %v352_v33 = vsub.f32 %v52_v14, %v202_v15  ;;  %v499_v34 = vmul.f32 %v348_v11, %v348_v11  ;;  %v205_v43 = vld [vmem:[%s1960_s0 + $0x110] sm:$0xff]  ;;  %v208_v48 = vld [vmem:[%s1960_s0 + $0x128] sm:$0xff]  ;;  %v57_v53 = vld [vmem:[%s1961_s1 + $0x120] sm:$0xff] }
  0x1a   :  { %v719_v19 = vadd.f32 %v718_v2, %v717_v8  ;;  %v724_v35 = vsel %vm702_vm1, %v495_v12, 0.0  ;;  %v351_v38 = vsub.f32 %v51_v20, %v201_v21  ;;  %v498_v39 = vmul.f32 %v347_v16, %v347_v16  ;;  %v207_v54 = vld [vmem:[%s1960_s0 + $0x120] sm:$0xff]  ;;  %v60_v58 = vld [vmem:[%s1961_s1 + $0x138] sm:$0xff]  ;;  %v59_v2 = vld [vmem:[%s1961_s1 + $0x130] sm:$0xff] }
  0x1b   :  { %v631_v29 = vadd.f32 %v630_v18, %v492_v6  ;;  %v354_v44 = vsub.f32 %v54_v25, %v204_v26  ;;  %v501_v45 = vmul.f32 %v350_v22, %v350_v22  ;;  %v726_v46 = vsel %vm702_vm1, %v497_v23, 0.0  ;;  %v210_v59 = vld [vmem:[%s1960_s0 + $0x138] sm:$0xff]  ;;  %v209_v3 = vld [vmem:[%s1960_s0 + $0x130] sm:$0xff]  ;;  %v62_v7 = vld [vmem:[%s1961_s1 + $0x148] sm:$0xff] }
  0x1c   :  { %v721_v30 = vadd.f32 %v720_v13, %v719_v19  ;;  %v353_v49 = vsub.f32 %v53_v31, %v203_v32  ;;  %v500_v50 = vmul.f32 %v349_v27, %v349_v27  ;;  %v356_v55 = vsub.f32 %v56_v36, %v206_v37  ;;  %v212_v8 = vld [vmem:[%s1960_s0 + $0x148] sm:$0xff]  ;;  %v61_v13 = vld [vmem:[%s1961_s1 + $0x140] sm:$0xff]  ;;  %v64_v18 = vld [vmem:[%s1961_s1 + $0x158] sm:$0xff] }
  0x1d   :  { %v632_v40 = vadd.f32 %v631_v29, %v494_v17  ;;  %v503_v56 = vmul.f32 %v352_v33, %v352_v33  ;;  %v728_v57 = vsel %vm702_vm1, %v499_v34, 0.0  ;;  %v355_v60 = vsub.f32 %v55_v42, %v205_v43  ;;  %v211_v14 = vld [vmem:[%s1960_s0 + $0x140] sm:$0xff]  ;;  %v214_v19 = vld [vmem:[%s1960_s0 + $0x158] sm:$0xff]  ;;  %v213_v25 = vld [vmem:[%s1960_s0 + $0x150] sm:$0xff] }
  0x1e   :  { %v723_v41 = vadd.f32 %v722_v24, %v721_v30  ;;  %v502_v61 = vmul.f32 %v351_v38, %v351_v38  ;;  %v358_v4 = vsub.f32 %v58_v47, %v208_v48  ;;  %v505_v5 = vmul.f32 %v354_v44, %v354_v44  ;;  %v63_v24 = vld [vmem:[%s1961_s1 + $0x150] sm:$0xff]  ;;  %v66_v29 = vld [vmem:[%s1961_s1 + $0x168] sm:$0xff]  ;;  %v215_v36 = vld [vmem:[%s1960_s0 + $0x160] sm:$0xff] }
  0x1f   :  { %v633_v51 = vadd.f32 %v632_v40, %v496_v28  ;;  %v730_v6 = vsel %vm702_vm1, %v501_v45, 0.0  ;;  %v357_v9 = vsub.f32 %v57_v53, %v207_v54  ;;  %v504_v10 = vmul.f32 %v353_v49, %v353_v49  ;;  %v216_v30 = vld [vmem:[%s1960_s0 + $0x168] sm:$0xff]  ;;  %v68_v40 = vld [vmem:[%s1961_s1 + $0x178] sm:$0xff]  ;;  %v217_v47 = vld [vmem:[%s1960_s0 + $0x170] sm:$0xff] }
  0x20   :  { %v725_v52 = vadd.f32 %v724_v35, %v723_v41  ;;  %v360_v15 = vsub.f32 %v60_v58, %v210_v59  ;;  %v507_v16 = vmul.f32 %v356_v55, %v356_v55  ;;  %v732_v17 = vsel %vm702_vm1, %v503_v56, 0.0  ;;  %v65_v35 = vld [vmem:[%s1961_s1 + $0x160] sm:$0xff]  ;;  %v218_v41 = vld [vmem:[%s1960_s0 + $0x178] sm:$0xff] }
  0x21   :  { %v634_v62 = vadd.f32 %v633_v51, %v498_v39  ;;  %v359_v20 = vsub.f32 %v59_v2, %v209_v3  ;;  %v506_v21 = vmul.f32 %v355_v60, %v355_v60  ;;  %v362_v26 = vsub.f32 %v62_v7, %v212_v8  ;;  %v70_v51 = vld [vmem:[%s1961_s1 + $0x188] sm:$0xff]  ;;  %v219_v58 = vld [vmem:[%s1960_s0 + $0x180] sm:$0xff]  ;;  %v221_v7 = vld [vmem:[%s1960_s0 + $0x190] sm:$0xff] }
  0x22   :  { %v727_v63 = vadd.f32 %v726_v46, %v725_v52  ;;  %v509_v27 = vmul.f32 %v358_v4, %v358_v4  ;;  %v734_v28 = vsel %vm702_vm1, %v505_v5, 0.0  ;;  %v361_v31 = vsub.f32 %v61_v13, %v211_v14  ;;  %v67_v46 = vld [vmem:[%s1961_s1 + $0x170] sm:$0xff]  ;;  %v220_v52 = vld [vmem:[%s1960_s0 + $0x188] sm:$0xff] }
  0x23   :  { %v635_v11 = vadd.f32 %v634_v62, %v500_v50  ;;  %v508_v32 = vmul.f32 %v357_v9, %v357_v9  ;;  %v364_v37 = vsub.f32 %v64_v18, %v214_v19  ;;  %v511_v38 = vmul.f32 %v360_v15, %v360_v15  ;;  %v72_v62 = vld [vmem:[%s1961_s1 + $0x198] sm:$0xff]  ;;  %v223_v18 = vld [vmem:[%s1960_s0 + $0x1a0] sm:$0xff] }
  0x24   :  { %v729_v12 = vadd.f32 %v728_v57, %v727_v63  ;;  %v736_v39 = vsel %vm702_vm1, %v507_v16, 0.0  ;;  %v363_v42 = vsub.f32 %v63_v24, %v213_v25  ;;  %v510_v43 = vmul.f32 %v359_v20, %v359_v20  ;;  %v69_v57 = vld [vmem:[%s1961_s1 + $0x180] sm:$0xff]  ;;  %v222_v63 = vld [vmem:[%s1960_s0 + $0x198] sm:$0xff] }
  0x25   :  { %v636_v22 = vadd.f32 %v635_v11, %v502_v61  ;;  %v366_v48 = vsub.f32 %v66_v29, %v216_v30  ;;  %v513_v49 = vmul.f32 %v362_v26, %v362_v26  ;;  %v738_v50 = vsel %vm702_vm1, %v509_v27, 0.0  ;;  %v74_v11 = vld [vmem:[%s1961_s1 + $0x1a8] sm:$0xff]  ;;  %v225_v29 = vld [vmem:[%s1960_s0 + $0x1b0] sm:$0xff] }
  0x26   :  { %v731_v23 = vadd.f32 %v730_v6, %v729_v12  ;;  %v365_v53 = vsub.f32 %v65_v35, %v215_v36  ;;  %v512_v54 = vmul.f32 %v361_v31, %v361_v31  ;;  %v368_v59 = vsub.f32 %v68_v40, %v218_v41  ;;  %v71_v6 = vld [vmem:[%s1961_s1 + $0x190] sm:$0xff]  ;;  %v224_v12 = vld [vmem:[%s1960_s0 + $0x1a8] sm:$0xff]  ;;  %v227_v40 = vld [vmem:[%s1960_s0 + $0x1c0] sm:$0xff] }
  0x27   :  { %v637_v33 = vadd.f32 %v636_v22, %v504_v10  ;;  %v515_v60 = vmul.f32 %v364_v37, %v364_v37  ;;  %v740_v61 = vsel %vm702_vm1, %v511_v38, 0.0  ;;  %v367_v2 = vsub.f32 %v67_v46, %v217_v47  ;;  %v76_v22 = vld [vmem:[%s1961_s1 + $0x1b8] sm:$0xff] }
  0x28   :  { %v733_v34 = vadd.f32 %v732_v17, %v731_v23  ;;  %v514_v3 = vmul.f32 %v363_v42, %v363_v42  ;;  %v370_v8 = vsub.f32 %v70_v51, %v220_v52  ;;  %v517_v9 = vmul.f32 %v366_v48, %v366_v48  ;;  %v73_v17 = vld [vmem:[%s1961_s1 + $0x1a0] sm:$0xff]  ;;  %v226_v23 = vld [vmem:[%s1960_s0 + $0x1b8] sm:$0xff]  ;;  %v229_v51 = vld [vmem:[%s1960_s0 + $0x1d0] sm:$0xff] }
  0x29   :  { %v638_v44 = vadd.f32 %v637_v33, %v506_v21  ;;  %v742_v10 = vsel %vm702_vm1, %v513_v49, 0.0  ;;  %v369_v13 = vsub.f32 %v69_v57, %v219_v58  ;;  %v516_v14 = vmul.f32 %v365_v53, %v365_v53  ;;  %v78_v33 = vld [vmem:[%s1961_s1 + $0x1c8] sm:$0xff] }
  0x2a   :  { %v735_v45 = vadd.f32 %v734_v28, %v733_v34  ;;  %v372_v19 = vsub.f32 %v72_v62, %v222_v63  ;;  %v519_v20 = vmul.f32 %v368_v59, %v368_v59  ;;  %v744_v21 = vsel %vm702_vm1, %v515_v60, 0.0  ;;  %v75_v28 = vld [vmem:[%s1961_s1 + $0x1b0] sm:$0xff]  ;;  %v228_v34 = vld [vmem:[%s1960_s0 + $0x1c8] sm:$0xff]  ;;  %v231_v62 = vld [vmem:[%s1960_s0 + $0x1e0] sm:$0xff] }
  0x2b   :  { %v639_v55 = vadd.f32 %v638_v44, %v508_v32  ;;  %v371_v24 = vsub.f32 %v71_v6, %v221_v7  ;;  %v518_v25 = vmul.f32 %v367_v2, %v367_v2  ;;  %v374_v30 = vsub.f32 %v74_v11, %v224_v12  ;;  %v80_v44 = vld [vmem:[%s1961_s1 + $0x1d8] sm:$0xff]  ;;  %v233_v11 = vld [vmem:[%s1960_s0 + $0x1f0] sm:$0xff] }
  0x2c   :  { %v737_v56 = vadd.f32 %v736_v39, %v735_v45  ;;  %v521_v31 = vmul.f32 %v370_v8, %v370_v8  ;;  %v746_v32 = vsel %vm702_vm1, %v517_v9, 0.0  ;;  %v373_v35 = vsub.f32 %v73_v17, %v223_v18  ;;  %v77_v39 = vld [vmem:[%s1961_s1 + $0x1c0] sm:$0xff]  ;;  %v230_v45 = vld [vmem:[%s1960_s0 + $0x1d8] sm:$0xff] }
  0x2d   :  { %v640_v4 = vadd.f32 %v639_v55, %v510_v43  ;;  %v520_v36 = vmul.f32 %v369_v13, %v369_v13  ;;  %v376_v41 = vsub.f32 %v76_v22, %v226_v23  ;;  %v523_v42 = vmul.f32 %v372_v19, %v372_v19  ;;  %v82_v55 = vld [vmem:[%s1961_s1 + $0x1e8] sm:$0xff]  ;;  %v235_v22 = vld [vmem:[%s1960_s0 + $0x200] sm:$0xff] }
  0x2e   :  { %v739_v5 = vadd.f32 %v738_v50, %v737_v56  ;;  %v748_v43 = vsel %vm702_vm1, %v519_v20, 0.0  ;;  %v375_v46 = vsub.f32 %v75_v28, %v225_v29  ;;  %v522_v47 = vmul.f32 %v371_v24, %v371_v24  ;;  %v79_v50 = vld [vmem:[%s1961_s1 + $0x1d0] sm:$0xff]  ;;  %v232_v56 = vld [vmem:[%s1960_s0 + $0x1e8] sm:$0xff] }
  0x2f   :  { %v641_v15 = vadd.f32 %v640_v4, %v512_v54  ;;  %v378_v52 = vsub.f32 %v78_v33, %v228_v34  ;;  %v525_v53 = vmul.f32 %v374_v30, %v374_v30  ;;  %v750_v54 = vsel %vm702_vm1, %v521_v31, 0.0  ;;  %v84_v4 = vld [vmem:[%s1961_s1 + $0x1f8] sm:$0xff]  ;;  %v237_v33 = vld [vmem:[%s1960_s0 + $0x210] sm:$0xff] }
  0x30   :  { %v741_v16 = vadd.f32 %v740_v61, %v739_v5  ;;  %v377_v57 = vsub.f32 %v77_v39, %v227_v40  ;;  %v524_v58 = vmul.f32 %v373_v35, %v373_v35  ;;  %v81_v61 = vld [vmem:[%s1961_s1 + $0x1e0] sm:$0xff]  ;;  %v380_v63 = vsub.f32 %v80_v44, %v230_v45  ;;  %v234_v5 = vld [vmem:[%s1960_s0 + $0x1f8] sm:$0xff] }
  0x31   :  { %v642_v26 = vadd.f32 %v641_v15, %v514_v3  ;;  %v527_v2 = vmul.f32 %v376_v41, %v376_v41  ;;  %v752_v3 = vsel %vm702_vm1, %v523_v42, 0.0  ;;  %v379_v6 = vsub.f32 %v79_v50, %v229_v51  ;;  %v86_v15 = vld [vmem:[%s1961_s1 + $0x208] sm:$0xff]  ;;  %v239_v44 = vld [vmem:[%s1960_s0 + $0x220] sm:$0xff] }
  0x32   :  { %v743_v27 = vadd.f32 %v742_v10, %v741_v16  ;;  %v526_v7 = vmul.f32 %v375_v46, %v375_v46  ;;  %v83_v10 = vld [vmem:[%s1961_s1 + $0x1f0] sm:$0xff]  ;;  %v382_v12 = vsub.f32 %v82_v55, %v232_v56  ;;  %v529_v13 = vmul.f32 %v378_v52, %v378_v52  ;;  %v236_v16 = vld [vmem:[%s1960_s0 + $0x208] sm:$0xff] }
  0x33   :  { %v643_v37 = vadd.f32 %v642_v26, %v516_v14  ;;  %v754_v14 = vsel %vm702_vm1, %v525_v53, 0.0  ;;  %v381_v17 = vsub.f32 %v81_v61, %v231_v62  ;;  %v528_v18 = vmul.f32 %v377_v57, %v377_v57  ;;  %v88_v26 = vld [vmem:[%s1961_s1 + $0x218] sm:$0xff]  ;;  %v241_v55 = vld [vmem:[%s1960_s0 + $0x230] sm:$0xff] }
  0x34   :  { %v745_v38 = vadd.f32 %v744_v21, %v743_v27  ;;  %v85_v21 = vld [vmem:[%s1961_s1 + $0x200] sm:$0xff]  ;;  %v384_v23 = vsub.f32 %v84_v4, %v234_v5  ;;  %v531_v24 = vmul.f32 %v380_v63, %v380_v63  ;;  %v238_v27 = vld [vmem:[%s1960_s0 + $0x218] sm:$0xff]  ;;  %v383_v28 = vsub.f32 %v83_v10, %v233_v11 }
  0x35   :  { %v644_v48 = vadd.f32 %v643_v37, %v518_v25  ;;  %v756_v25 = vsel %vm702_vm1, %v527_v2, 0.0  ;;  %v530_v29 = vmul.f32 %v379_v6, %v379_v6  ;;  %v386_v34 = vsub.f32 %v86_v15, %v236_v16  ;;  %v90_v37 = vld [vmem:[%s1961_s1 + $0x228] sm:$0xff]  ;;  %v243_v4 = vld [vmem:[%s1960_s0 + $0x240] sm:$0xff]  ;;  %v245_v15 = vld [vmem:[%s1960_s0 + $0x250] sm:$0xff] }
  0x36   :  { %v747_v49 = vadd.f32 %v746_v32, %v745_v38  ;;  %v87_v32 = vld [vmem:[%s1961_s1 + $0x210] sm:$0xff]  ;;  %v533_v35 = vmul.f32 %v382_v12, %v382_v12  ;;  %v240_v38 = vld [vmem:[%s1960_s0 + $0x228] sm:$0xff]  ;;  %v385_v39 = vsub.f32 %v85_v21, %v235_v22  ;;  %v532_v40 = vmul.f32 %v381_v17, %v381_v17 }
  0x37   :  { %v645_v59 = vadd.f32 %v644_v48, %v520_v36  ;;  %v758_v36 = vsel %vm702_vm1, %v529_v13, 0.0  ;;  %v388_v45 = vsub.f32 %v88_v26, %v238_v27  ;;  %v535_v46 = vmul.f32 %v384_v23, %v384_v23  ;;  %v92_v48 = vld [vmem:[%s1961_s1 + $0x238] sm:$0xff]  ;;  %v247_v26 = vld [vmem:[%s1960_s0 + $0x260] sm:$0xff] }
  0x38   :  { %v749_v60 = vadd.f32 %v748_v43, %v747_v49  ;;  %v89_v43 = vld [vmem:[%s1961_s1 + $0x220] sm:$0xff]  ;;  %v242_v49 = vld [vmem:[%s1960_s0 + $0x238] sm:$0xff]  ;;  %v387_v50 = vsub.f32 %v87_v32, %v237_v33  ;;  %v534_v51 = vmul.f32 %v383_v28, %v383_v28  ;;  %v390_v56 = vsub.f32 %v90_v37, %v240_v38  ;;  %v249_v37 = vld [vmem:[%s1960_s0 + $0x270] sm:$0xff] }
  0x39   :  { %v646_v8 = vadd.f32 %v645_v59, %v522_v47  ;;  %v760_v47 = vsel %vm702_vm1, %v531_v24, 0.0  ;;  %v537_v57 = vmul.f32 %v386_v34, %v386_v34  ;;  %v94_v59 = vld [vmem:[%s1961_s1 + $0x248] sm:$0xff]  ;;  %v389_v61 = vsub.f32 %v89_v43, %v239_v44 }
  0x3a   :  { %v751_v9 = vadd.f32 %v750_v54, %v749_v60  ;;  %v91_v54 = vld [vmem:[%s1961_s1 + $0x230] sm:$0xff]  ;;  %v244_v60 = vld [vmem:[%s1960_s0 + $0x248] sm:$0xff]  ;;  %v536_v62 = vmul.f32 %v385_v39, %v385_v39  ;;  %v392_v5 = vsub.f32 %v92_v48, %v242_v49  ;;  %v539_v6 = vmul.f32 %v388_v45, %v388_v45  ;;  %v251_v48 = vld [vmem:[%s1960_s0 + $0x280] sm:$0xff] }
  0x3b   :  { %v647_v19 = vadd.f32 %v646_v8, %v524_v58  ;;  %v762_v58 = vsel %vm702_vm1, %v533_v35, 0.0  ;;  %v96_v8 = vld [vmem:[%s1961_s1 + $0x258] sm:$0xff]  ;;  %v391_v10 = vsub.f32 %v91_v54, %v241_v55  ;;  %v538_v11 = vmul.f32 %v387_v50, %v387_v50 }
  0x3c   :  { %v753_v20 = vadd.f32 %v752_v3, %v751_v9  ;;  %v93_v3 = vld [vmem:[%s1961_s1 + $0x240] sm:$0xff]  ;;  %v246_v9 = vld [vmem:[%s1960_s0 + $0x258] sm:$0xff]  ;;  %v394_v16 = vsub.f32 %v94_v59, %v244_v60  ;;  %v541_v17 = vmul.f32 %v390_v56, %v390_v56  ;;  %v540_v22 = vmul.f32 %v389_v61, %v389_v61  ;;  %v253_v59 = vld [vmem:[%s1960_s0 + $0x290] sm:$0xff] }
  0x3d   :  { %v648_v30 = vadd.f32 %v647_v19, %v526_v7  ;;  %v764_v7 = vsel %vm702_vm1, %v535_v46, 0.0  ;;  %v98_v19 = vld [vmem:[%s1961_s1 + $0x268] sm:$0xff]  ;;  %v393_v21 = vsub.f32 %v93_v3, %v243_v4  ;;  %v396_v27 = vsub.f32 %v96_v8, %v246_v9  ;;  %v255_v8 = vld [vmem:[%s1960_s0 + $0x2a0] sm:$0xff] }
  0x3e   :  { %v755_v31 = vadd.f32 %v754_v14, %v753_v20  ;;  %v95_v14 = vld [vmem:[%s1961_s1 + $0x250] sm:$0xff]  ;;  %v248_v20 = vld [vmem:[%s1960_s0 + $0x268] sm:$0xff]  ;;  %v543_v28 = vmul.f32 %v392_v5, %v392_v5  ;;  %v542_v33 = vmul.f32 %v391_v10, %v391_v10  ;;  %v545_v39 = vmul.f32 %v394_v16, %v394_v16 }
  0x3f   :  { %v649_v41 = vadd.f32 %v648_v30, %v528_v18  ;;  %v766_v18 = vsel %vm702_vm1, %v537_v57, 0.0  ;;  %v100_v30 = vld [vmem:[%s1961_s1 + $0x278] sm:$0xff]  ;;  %v395_v32 = vsub.f32 %v95_v14, %v245_v15  ;;  %v398_v38 = vsub.f32 %v98_v19, %v248_v20  ;;  %v257_v19 = vld [vmem:[%s1960_s0 + $0x2b0] sm:$0xff] }
  0x40   :  { %v757_v42 = vadd.f32 %v756_v25, %v755_v31  ;;  %v97_v25 = vld [vmem:[%s1961_s1 + $0x260] sm:$0xff]  ;;  %v250_v31 = vld [vmem:[%s1960_s0 + $0x278] sm:$0xff]  ;;  %v544_v44 = vmul.f32 %v393_v21, %v393_v21  ;;  %v547_v50 = vmul.f32 %v396_v27, %v396_v27 }
  0x41   :  { %v650_v52 = vadd.f32 %v649_v41, %v530_v29  ;;  %v768_v29 = vsel %vm702_vm1, %v539_v6, 0.0  ;;  %v102_v41 = vld [vmem:[%s1961_s1 + $0x288] sm:$0xff]  ;;  %v397_v43 = vsub.f32 %v97_v25, %v247_v26  ;;  %v400_v49 = vsub.f32 %v100_v30, %v250_v31  ;;  %v259_v30 = vld [vmem:[%s1960_s0 + $0x2c0] sm:$0xff] }
  0x42   :  { %v759_v53 = vadd.f32 %v758_v36, %v757_v42  ;;  %v99_v36 = vld [vmem:[%s1961_s1 + $0x270] sm:$0xff]  ;;  %v252_v42 = vld [vmem:[%s1960_s0 + $0x288] sm:$0xff]  ;;  %v546_v55 = vmul.f32 %v395_v32, %v395_v32  ;;  %v549_v61 = vmul.f32 %v398_v38, %v398_v38 }
  0x43   :  { %v651_v63 = vadd.f32 %v650_v52, %v532_v40  ;;  %v770_v40 = vsel %vm702_vm1, %v541_v17, 0.0  ;;  %v104_v52 = vld [vmem:[%s1961_s1 + $0x298] sm:$0xff]  ;;  %v399_v54 = vsub.f32 %v99_v36, %v249_v37  ;;  %v402_v60 = vsub.f32 %v102_v41, %v252_v42  ;;  %v261_v41 = vld [vmem:[%s1960_s0 + $0x2d0] sm:$0xff] }
  0x44   :  { %v761_v2 = vadd.f32 %v760_v47, %v759_v53  ;;  %v101_v47 = vld [vmem:[%s1961_s1 + $0x280] sm:$0xff]  ;;  %v254_v53 = vld [vmem:[%s1960_s0 + $0x298] sm:$0xff]  ;;  %v548_v4 = vmul.f32 %v397_v43, %v397_v43  ;;  %v551_v10 = vmul.f32 %v400_v49, %v400_v49 }
  0x45   :  { %v652_v12 = vadd.f32 %v651_v63, %v534_v51  ;;  %v772_v51 = vsel %vm702_vm1, %v543_v28, 0.0  ;;  %v106_v63 = vld [vmem:[%s1961_s1 + $0x2a8] sm:$0xff]  ;;  %v401_v3 = vsub.f32 %v101_v47, %v251_v48  ;;  %v404_v9 = vsub.f32 %v104_v52, %v254_v53  ;;  %v263_v52 = vld [vmem:[%s1960_s0 + $0x2e0] sm:$0xff] }
  0x46   :  { %v763_v13 = vadd.f32 %v762_v58, %v761_v2  ;;  %v103_v58 = vld [vmem:[%s1961_s1 + $0x290] sm:$0xff]  ;;  %v256_v2 = vld [vmem:[%s1960_s0 + $0x2a8] sm:$0xff]  ;;  %v550_v15 = vmul.f32 %v399_v54, %v399_v54  ;;  %v553_v21 = vmul.f32 %v402_v60, %v402_v60 }
  0x47   :  { %v653_v23 = vadd.f32 %v652_v12, %v536_v62  ;;  %v774_v62 = vsel %vm702_vm1, %v545_v39, 0.0  ;;  %v108_v12 = vld [vmem:[%s1961_s1 + $0x2b8] sm:$0xff]  ;;  %v403_v14 = vsub.f32 %v103_v58, %v253_v59  ;;  %v406_v20 = vsub.f32 %v106_v63, %v256_v2  ;;  %v265_v63 = vld [vmem:[%s1960_s0 + $0x2f0] sm:$0xff] }
  0x48   :  { %v765_v24 = vadd.f32 %v764_v7, %v763_v13  ;;  %v105_v7 = vld [vmem:[%s1961_s1 + $0x2a0] sm:$0xff]  ;;  %v258_v13 = vld [vmem:[%s1960_s0 + $0x2b8] sm:$0xff]  ;;  %v552_v26 = vmul.f32 %v401_v3, %v401_v3  ;;  %v555_v32 = vmul.f32 %v404_v9, %v404_v9 }
  0x49   :  { %v654_v34 = vadd.f32 %v653_v23, %v538_v11  ;;  %v776_v11 = vsel %vm702_vm1, %v547_v50, 0.0  ;;  %v110_v23 = vld [vmem:[%s1961_s1 + $0x2c8] sm:$0xff]  ;;  %v405_v25 = vsub.f32 %v105_v7, %v255_v8  ;;  %v408_v31 = vsub.f32 %v108_v12, %v258_v13  ;;  %v267_v12 = vld [vmem:[%s1960_s0 + $0x300] sm:$0xff] }
  0x4a   :  { %v767_v35 = vadd.f32 %v766_v18, %v765_v24  ;;  %v107_v18 = vld [vmem:[%s1961_s1 + $0x2b0] sm:$0xff]  ;;  %v260_v24 = vld [vmem:[%s1960_s0 + $0x2c8] sm:$0xff]  ;;  %v554_v37 = vmul.f32 %v403_v14, %v403_v14  ;;  %v557_v43 = vmul.f32 %v406_v20, %v406_v20 }
  0x4b   :  { %v655_v45 = vadd.f32 %v654_v34, %v540_v22  ;;  %v778_v22 = vsel %vm702_vm1, %v549_v61, 0.0  ;;  %v112_v34 = vld [vmem:[%s1961_s1 + $0x2d8] sm:$0xff]  ;;  %v407_v36 = vsub.f32 %v107_v18, %v257_v19  ;;  %v410_v42 = vsub.f32 %v110_v23, %v260_v24  ;;  %v269_v23 = vld [vmem:[%s1960_s0 + $0x310] sm:$0xff] }
  0x4c   :  { %v769_v46 = vadd.f32 %v768_v29, %v767_v35  ;;  %v109_v29 = vld [vmem:[%s1961_s1 + $0x2c0] sm:$0xff]  ;;  %v262_v35 = vld [vmem:[%s1960_s0 + $0x2d8] sm:$0xff]  ;;  %v556_v48 = vmul.f32 %v405_v25, %v405_v25  ;;  %v559_v54 = vmul.f32 %v408_v31, %v408_v31 }
  0x4d   :  { %v656_v56 = vadd.f32 %v655_v45, %v542_v33  ;;  %v780_v33 = vsel %vm702_vm1, %v551_v10, 0.0  ;;  %v114_v45 = vld [vmem:[%s1961_s1 + $0x2e8] sm:$0xff]  ;;  %v409_v47 = vsub.f32 %v109_v29, %v259_v30  ;;  %v412_v53 = vsub.f32 %v112_v34, %v262_v35  ;;  %v271_v34 = vld [vmem:[%s1960_s0 + $0x320] sm:$0xff] }
  0x4e   :  { %v771_v57 = vadd.f32 %v770_v40, %v769_v46  ;;  %v111_v40 = vld [vmem:[%s1961_s1 + $0x2d0] sm:$0xff]  ;;  %v264_v46 = vld [vmem:[%s1960_s0 + $0x2e8] sm:$0xff]  ;;  %v558_v59 = vmul.f32 %v407_v36, %v407_v36  ;;  %v561_v3 = vmul.f32 %v410_v42, %v410_v42 }
  0x4f   :  { %v657_v5 = vadd.f32 %v656_v56, %v544_v44  ;;  %v782_v44 = vsel %vm702_vm1, %v553_v21, 0.0  ;;  %v116_v56 = vld [vmem:[%s1961_s1 + $0x2f8] sm:$0xff]  ;;  %v411_v58 = vsub.f32 %v111_v40, %v261_v41  ;;  %v414_v2 = vsub.f32 %v114_v45, %v264_v46  ;;  %v273_v45 = vld [vmem:[%s1960_s0 + $0x330] sm:$0xff] }
  0x50   :  { %v773_v6 = vadd.f32 %v772_v51, %v771_v57  ;;  %v113_v51 = vld [vmem:[%s1961_s1 + $0x2e0] sm:$0xff]  ;;  %v266_v57 = vld [vmem:[%s1960_s0 + $0x2f8] sm:$0xff]  ;;  %v560_v8 = vmul.f32 %v409_v47, %v409_v47  ;;  %v563_v14 = vmul.f32 %v412_v53, %v412_v53 }
  0x51   :  { %v658_v16 = vadd.f32 %v657_v5, %v546_v55  ;;  %v784_v55 = vsel %vm702_vm1, %v555_v32, 0.0  ;;  %v118_v5 = vld [vmem:[%s1961_s1 + $0x308] sm:$0xff]  ;;  %v413_v7 = vsub.f32 %v113_v51, %v263_v52  ;;  %v416_v13 = vsub.f32 %v116_v56, %v266_v57  ;;  %v275_v56 = vld [vmem:[%s1960_s0 + $0x340] sm:$0xff] }
  0x52   :  { %v775_v17 = vadd.f32 %v774_v62, %v773_v6  ;;  %v115_v62 = vld [vmem:[%s1961_s1 + $0x2f0] sm:$0xff]  ;;  %v268_v6 = vld [vmem:[%s1960_s0 + $0x308] sm:$0xff]  ;;  %v562_v19 = vmul.f32 %v411_v58, %v411_v58  ;;  %v565_v25 = vmul.f32 %v414_v2, %v414_v2 }
  0x53   :  { %v659_v27 = vadd.f32 %v658_v16, %v548_v4  ;;  %v786_v4 = vsel %vm702_vm1, %v557_v43, 0.0  ;;  %v120_v16 = vld [vmem:[%s1961_s1 + $0x318] sm:$0xff]  ;;  %v415_v18 = vsub.f32 %v115_v62, %v265_v63  ;;  %v418_v24 = vsub.f32 %v118_v5, %v268_v6  ;;  %v277_v5 = vld [vmem:[%s1960_s0 + $0x350] sm:$0xff] }
  0x54   :  { %v777_v28 = vadd.f32 %v776_v11, %v775_v17  ;;  %v117_v11 = vld [vmem:[%s1961_s1 + $0x300] sm:$0xff]  ;;  %v270_v17 = vld [vmem:[%s1960_s0 + $0x318] sm:$0xff]  ;;  %v564_v30 = vmul.f32 %v413_v7, %v413_v7  ;;  %v567_v36 = vmul.f32 %v416_v13, %v416_v13 }
  0x55   :  { %v660_v38 = vadd.f32 %v659_v27, %v550_v15  ;;  %v788_v15 = vsel %vm702_vm1, %v559_v54, 0.0  ;;  %v122_v27 = vld [vmem:[%s1961_s1 + $0x328] sm:$0xff]  ;;  %v417_v29 = vsub.f32 %v117_v11, %v267_v12  ;;  %v420_v35 = vsub.f32 %v120_v16, %v270_v17  ;;  %v279_v16 = vld [vmem:[%s1960_s0 + $0x360] sm:$0xff] }
  0x56   :  { %v779_v39 = vadd.f32 %v778_v22, %v777_v28  ;;  %v119_v22 = vld [vmem:[%s1961_s1 + $0x310] sm:$0xff]  ;;  %v272_v28 = vld [vmem:[%s1960_s0 + $0x328] sm:$0xff]  ;;  %v566_v41 = vmul.f32 %v415_v18, %v415_v18  ;;  %v569_v47 = vmul.f32 %v418_v24, %v418_v24 }
  0x57   :  { %v661_v49 = vadd.f32 %v660_v38, %v552_v26  ;;  %v790_v26 = vsel %vm702_vm1, %v561_v3, 0.0  ;;  %v124_v38 = vld [vmem:[%s1961_s1 + $0x338] sm:$0xff]  ;;  %v419_v40 = vsub.f32 %v119_v22, %v269_v23  ;;  %v422_v46 = vsub.f32 %v122_v27, %v272_v28  ;;  %v281_v27 = vld [vmem:[%s1960_s0 + $0x370] sm:$0xff] }
  0x58   :  { %v781_v50 = vadd.f32 %v780_v33, %v779_v39  ;;  %v121_v33 = vld [vmem:[%s1961_s1 + $0x320] sm:$0xff]  ;;  %v274_v39 = vld [vmem:[%s1960_s0 + $0x338] sm:$0xff]  ;;  %v568_v52 = vmul.f32 %v417_v29, %v417_v29  ;;  %v571_v58 = vmul.f32 %v420_v35, %v420_v35 }
  0x59   :  { %v662_v60 = vadd.f32 %v661_v49, %v554_v37  ;;  %v792_v37 = vsel %vm702_vm1, %v563_v14, 0.0  ;;  %v126_v49 = vld [vmem:[%s1961_s1 + $0x348] sm:$0xff]  ;;  %v421_v51 = vsub.f32 %v121_v33, %v271_v34  ;;  %v424_v57 = vsub.f32 %v124_v38, %v274_v39  ;;  %v283_v38 = vld [vmem:[%s1960_s0 + $0x380] sm:$0xff] }
  0x5a   :  { %v783_v61 = vadd.f32 %v782_v44, %v781_v50  ;;  %v123_v44 = vld [vmem:[%s1961_s1 + $0x330] sm:$0xff]  ;;  %v276_v50 = vld [vmem:[%s1960_s0 + $0x348] sm:$0xff]  ;;  %v570_v63 = vmul.f32 %v419_v40, %v419_v40  ;;  %v573_v7 = vmul.f32 %v422_v46, %v422_v46 }
  0x5b   :  { %v663_v9 = vadd.f32 %v662_v60, %v556_v48  ;;  %v794_v48 = vsel %vm702_vm1, %v565_v25, 0.0  ;;  %v128_v60 = vld [vmem:[%s1961_s1 + $0x358] sm:$0xff]  ;;  %v423_v62 = vsub.f32 %v123_v44, %v273_v45  ;;  %v426_v6 = vsub.f32 %v126_v49, %v276_v50  ;;  %v285_v49 = vld [vmem:[%s1960_s0 + $0x390] sm:$0xff] }
  0x5c   :  { %v785_v10 = vadd.f32 %v784_v55, %v783_v61  ;;  %v125_v55 = vld [vmem:[%s1961_s1 + $0x340] sm:$0xff]  ;;  %v278_v61 = vld [vmem:[%s1960_s0 + $0x358] sm:$0xff]  ;;  %v572_v12 = vmul.f32 %v421_v51, %v421_v51  ;;  %v575_v18 = vmul.f32 %v424_v57, %v424_v57 }
  0x5d   :  { %v664_v20 = vadd.f32 %v663_v9, %v558_v59  ;;  %v796_v59 = vsel %vm702_vm1, %v567_v36, 0.0  ;;  %v130_v9 = vld [vmem:[%s1961_s1 + $0x368] sm:$0xff]  ;;  %v425_v11 = vsub.f32 %v125_v55, %v275_v56  ;;  %v428_v17 = vsub.f32 %v128_v60, %v278_v61  ;;  %v287_v60 = vld [vmem:[%s1960_s0 + $0x3a0] sm:$0xff] }
  0x5e   :  { %v787_v21 = vadd.f32 %v786_v4, %v785_v10  ;;  %v127_v4 = vld [vmem:[%s1961_s1 + $0x350] sm:$0xff]  ;;  %v280_v10 = vld [vmem:[%s1960_s0 + $0x368] sm:$0xff]  ;;  %v574_v23 = vmul.f32 %v423_v62, %v423_v62  ;;  %v577_v29 = vmul.f32 %v426_v6, %v426_v6 }
  0x5f   :  { %v665_v31 = vadd.f32 %v664_v20, %v560_v8  ;;  %v798_v8 = vsel %vm702_vm1, %v569_v47, 0.0  ;;  %v132_v20 = vld [vmem:[%s1961_s1 + $0x378] sm:$0xff]  ;;  %v427_v22 = vsub.f32 %v127_v4, %v277_v5  ;;  %v430_v28 = vsub.f32 %v130_v9, %v280_v10  ;;  %v289_v9 = vld [vmem:[%s1960_s0 + $0x3b0] sm:$0xff] }
  0x60   :  { %v789_v32 = vadd.f32 %v788_v15, %v787_v21  ;;  %v129_v15 = vld [vmem:[%s1961_s1 + $0x360] sm:$0xff]  ;;  %v282_v21 = vld [vmem:[%s1960_s0 + $0x378] sm:$0xff]  ;;  %v576_v34 = vmul.f32 %v425_v11, %v425_v11  ;;  %v579_v40 = vmul.f32 %v428_v17, %v428_v17 }
  0x61   :  { %v666_v42 = vadd.f32 %v665_v31, %v562_v19  ;;  %v800_v19 = vsel %vm702_vm1, %v571_v58, 0.0  ;;  %v134_v31 = vld [vmem:[%s1961_s1 + $0x388] sm:$0xff]  ;;  %v429_v33 = vsub.f32 %v129_v15, %v279_v16  ;;  %v432_v39 = vsub.f32 %v132_v20, %v282_v21  ;;  %v291_v20 = vld [vmem:[%s1960_s0 + $0x3c0] sm:$0xff] }
  0x62   :  { %v791_v43 = vadd.f32 %v790_v26, %v789_v32  ;;  %v131_v26 = vld [vmem:[%s1961_s1 + $0x370] sm:$0xff]  ;;  %v284_v32 = vld [vmem:[%s1960_s0 + $0x388] sm:$0xff]  ;;  %v578_v45 = vmul.f32 %v427_v22, %v427_v22  ;;  %v581_v51 = vmul.f32 %v430_v28, %v430_v28 }
  0x63   :  { %v667_v53 = vadd.f32 %v666_v42, %v564_v30  ;;  %v802_v30 = vsel %vm702_vm1, %v573_v7, 0.0  ;;  %v136_v42 = vld [vmem:[%s1961_s1 + $0x398] sm:$0xff]  ;;  %v431_v44 = vsub.f32 %v131_v26, %v281_v27  ;;  %v434_v50 = vsub.f32 %v134_v31, %v284_v32  ;;  %v293_v31 = vld [vmem:[%s1960_s0 + $0x3d0] sm:$0xff] }
  0x64   :  { %v793_v54 = vadd.f32 %v792_v37, %v791_v43  ;;  %v133_v37 = vld [vmem:[%s1961_s1 + $0x380] sm:$0xff]  ;;  %v286_v43 = vld [vmem:[%s1960_s0 + $0x398] sm:$0xff]  ;;  %v580_v56 = vmul.f32 %v429_v33, %v429_v33  ;;  %v583_v62 = vmul.f32 %v432_v39, %v432_v39 }
  0x65   :  { %v668_v2 = vadd.f32 %v667_v53, %v566_v41  ;;  %v804_v41 = vsel %vm702_vm1, %v575_v18, 0.0  ;;  %v138_v53 = vld [vmem:[%s1961_s1 + $0x3a8] sm:$0xff]  ;;  %v433_v55 = vsub.f32 %v133_v37, %v283_v38  ;;  %v436_v61 = vsub.f32 %v136_v42, %v286_v43  ;;  %v295_v42 = vld [vmem:[%s1960_s0 + $0x3e0] sm:$0xff] }
  0x66   :  { %v795_v3 = vadd.f32 %v794_v48, %v793_v54  ;;  %v135_v48 = vld [vmem:[%s1961_s1 + $0x390] sm:$0xff]  ;;  %v288_v54 = vld [vmem:[%s1960_s0 + $0x3a8] sm:$0xff]  ;;  %v582_v5 = vmul.f32 %v431_v44, %v431_v44  ;;  %v585_v11 = vmul.f32 %v434_v50, %v434_v50 }
  0x67   :  { %v669_v13 = vadd.f32 %v668_v2, %v568_v52  ;;  %v806_v52 = vsel %vm702_vm1, %v577_v29, 0.0  ;;  %v140_v2 = vld [vmem:[%s1961_s1 + $0x3b8] sm:$0xff]  ;;  %v435_v4 = vsub.f32 %v135_v48, %v285_v49  ;;  %v438_v10 = vsub.f32 %v138_v53, %v288_v54  ;;  %v297_v53 = vld [vmem:[%s1960_s0 + $0x3f0] sm:$0xff] }
  0x68   :  { %v797_v14 = vadd.f32 %v796_v59, %v795_v3  ;;  %v137_v59 = vld [vmem:[%s1961_s1 + $0x3a0] sm:$0xff]  ;;  %v290_v3 = vld [vmem:[%s1960_s0 + $0x3b8] sm:$0xff]  ;;  %v584_v16 = vmul.f32 %v433_v55, %v433_v55  ;;  %v587_v22 = vmul.f32 %v436_v61, %v436_v61 }
  0x69   :  { %v670_v24 = vadd.f32 %v669_v13, %v570_v63  ;;  %v808_v63 = vsel %vm702_vm1, %v579_v40, 0.0  ;;  %v142_v13 = vld [vmem:[%s1961_s1 + $0x3c8] sm:$0xff]  ;;  %v437_v15 = vsub.f32 %v137_v59, %v287_v60  ;;  %v440_v21 = vsub.f32 %v140_v2, %v290_v3  ;;  %v299_v2 = vld [vmem:[%s1960_s0 + $0x400] sm:$0xff] }
  0x6a   :  { %v799_v25 = vadd.f32 %v798_v8, %v797_v14  ;;  %v139_v8 = vld [vmem:[%s1961_s1 + $0x3b0] sm:$0xff]  ;;  %v292_v14 = vld [vmem:[%s1960_s0 + $0x3c8] sm:$0xff]  ;;  %v586_v27 = vmul.f32 %v435_v4, %v435_v4  ;;  %v589_v33 = vmul.f32 %v438_v10, %v438_v10 }
  0x6b   :  { %v671_v35 = vadd.f32 %v670_v24, %v572_v12  ;;  %v810_v12 = vsel %vm702_vm1, %v581_v51, 0.0  ;;  %v144_v24 = vld [vmem:[%s1961_s1 + $0x3d8] sm:$0xff]  ;;  %v439_v26 = vsub.f32 %v139_v8, %v289_v9  ;;  %v442_v32 = vsub.f32 %v142_v13, %v292_v14  ;;  %v301_v13 = vld [vmem:[%s1960_s0 + $0x410] sm:$0xff] }
  0x6c   :  { %v801_v36 = vadd.f32 %v800_v19, %v799_v25  ;;  %v141_v19 = vld [vmem:[%s1961_s1 + $0x3c0] sm:$0xff]  ;;  %v294_v25 = vld [vmem:[%s1960_s0 + $0x3d8] sm:$0xff]  ;;  %v588_v38 = vmul.f32 %v437_v15, %v437_v15  ;;  %v591_v44 = vmul.f32 %v440_v21, %v440_v21 }
  0x6d   :  { %v672_v46 = vadd.f32 %v671_v35, %v574_v23  ;;  %v812_v23 = vsel %vm702_vm1, %v583_v62, 0.0  ;;  %v146_v35 = vld [vmem:[%s1961_s1 + $0x3e8] sm:$0xff]  ;;  %v441_v37 = vsub.f32 %v141_v19, %v291_v20  ;;  %v444_v43 = vsub.f32 %v144_v24, %v294_v25  ;;  %v303_v24 = vld [vmem:[%s1960_s0 + $0x420] sm:$0xff] }
  0x6e   :  { %v803_v47 = vadd.f32 %v802_v30, %v801_v36  ;;  %v143_v30 = vld [vmem:[%s1961_s1 + $0x3d0] sm:$0xff]  ;;  %v296_v36 = vld [vmem:[%s1960_s0 + $0x3e8] sm:$0xff]  ;;  %v590_v49 = vmul.f32 %v439_v26, %v439_v26  ;;  %v593_v55 = vmul.f32 %v442_v32, %v442_v32 }
  0x6f   :  { %v673_v57 = vadd.f32 %v672_v46, %v576_v34  ;;  %v814_v34 = vsel %vm702_vm1, %v585_v11, 0.0  ;;  %v148_v46 = vld [vmem:[%s1961_s1 + $0x3f8] sm:$0xff]  ;;  %v443_v48 = vsub.f32 %v143_v30, %v293_v31  ;;  %v446_v54 = vsub.f32 %v146_v35, %v296_v36  ;;  %v305_v35 = vld [vmem:[%s1960_s0 + $0x430] sm:$0xff] }
  0x70   :  { %v805_v58 = vadd.f32 %v804_v41, %v803_v47  ;;  %v145_v41 = vld [vmem:[%s1961_s1 + $0x3e0] sm:$0xff]  ;;  %v298_v47 = vld [vmem:[%s1960_s0 + $0x3f8] sm:$0xff]  ;;  %v592_v60 = vmul.f32 %v441_v37, %v441_v37  ;;  %v595_v4 = vmul.f32 %v444_v43, %v444_v43 }
  0x71   :  { %v674_v6 = vadd.f32 %v673_v57, %v578_v45  ;;  %v816_v45 = vsel %vm702_vm1, %v587_v22, 0.0  ;;  %v150_v57 = vld [vmem:[%s1961_s1 + $0x408] sm:$0xff]  ;;  %v445_v59 = vsub.f32 %v145_v41, %v295_v42  ;;  %v448_v3 = vsub.f32 %v148_v46, %v298_v47  ;;  %v307_v46 = vld [vmem:[%s1960_s0 + $0x440] sm:$0xff] }
  0x72   :  { %v807_v7 = vadd.f32 %v806_v52, %v805_v58  ;;  %v147_v52 = vld [vmem:[%s1961_s1 + $0x3f0] sm:$0xff]  ;;  %v300_v58 = vld [vmem:[%s1960_s0 + $0x408] sm:$0xff]  ;;  %v594_v9 = vmul.f32 %v443_v48, %v443_v48  ;;  %v597_v15 = vmul.f32 %v446_v54, %v446_v54 }
  0x73   :  { %v675_v17 = vadd.f32 %v674_v6, %v580_v56  ;;  %v818_v56 = vsel %vm702_vm1, %v589_v33, 0.0  ;;  %v152_v6 = vld [vmem:[%s1961_s1 + $0x418] sm:$0xff]  ;;  %v447_v8 = vsub.f32 %v147_v52, %v297_v53  ;;  %v450_v14 = vsub.f32 %v150_v57, %v300_v58  ;;  %v309_v57 = vld [vmem:[%s1960_s0 + $0x450] sm:$0xff] }
  0x74   :  { %v809_v18 = vadd.f32 %v808_v63, %v807_v7  ;;  %v149_v63 = vld [vmem:[%s1961_s1 + $0x400] sm:$0xff]  ;;  %v302_v7 = vld [vmem:[%s1960_s0 + $0x418] sm:$0xff]  ;;  %v596_v20 = vmul.f32 %v445_v59, %v445_v59  ;;  %v599_v26 = vmul.f32 %v448_v3, %v448_v3 }
  0x75   :  { %v676_v28 = vadd.f32 %v675_v17, %v582_v5  ;;  %v820_v5 = vsel %vm702_vm1, %v591_v44, 0.0  ;;  %v154_v17 = vld [vmem:[%s1961_s1 + $0x428] sm:$0xff]  ;;  %v449_v19 = vsub.f32 %v149_v63, %v299_v2  ;;  %v452_v25 = vsub.f32 %v152_v6, %v302_v7  ;;  %v311_v6 = vld [vmem:[%s1960_s0 + $0x460] sm:$0xff] }
  0x76   :  { %v811_v29 = vadd.f32 %v810_v12, %v809_v18  ;;  %v151_v12 = vld [vmem:[%s1961_s1 + $0x410] sm:$0xff]  ;;  %v304_v18 = vld [vmem:[%s1960_s0 + $0x428] sm:$0xff]  ;;  %v598_v31 = vmul.f32 %v447_v8, %v447_v8  ;;  %v601_v37 = vmul.f32 %v450_v14, %v450_v14 }
  0x77   :  { %v677_v39 = vadd.f32 %v676_v28, %v584_v16  ;;  %v822_v16 = vsel %vm702_vm1, %v593_v55, 0.0  ;;  %v156_v28 = vld [vmem:[%s1961_s1 + $0x438] sm:$0xff]  ;;  %v451_v30 = vsub.f32 %v151_v12, %v301_v13  ;;  %v454_v36 = vsub.f32 %v154_v17, %v304_v18  ;;  %v313_v17 = vld [vmem:[%s1960_s0 + $0x470] sm:$0xff] }
  0x78   :  { %v813_v40 = vadd.f32 %v812_v23, %v811_v29  ;;  %v153_v23 = vld [vmem:[%s1961_s1 + $0x420] sm:$0xff]  ;;  %v306_v29 = vld [vmem:[%s1960_s0 + $0x438] sm:$0xff]  ;;  %v600_v42 = vmul.f32 %v449_v19, %v449_v19  ;;  %v603_v48 = vmul.f32 %v452_v25, %v452_v25 }
  0x79   :  { %v678_v50 = vadd.f32 %v677_v39, %v586_v27  ;;  %v824_v27 = vsel %vm702_vm1, %v595_v4, 0.0  ;;  %v158_v39 = vld [vmem:[%s1961_s1 + $0x448] sm:$0xff]  ;;  %v453_v41 = vsub.f32 %v153_v23, %v303_v24  ;;  %v456_v47 = vsub.f32 %v156_v28, %v306_v29  ;;  %v315_v28 = vld [vmem:[%s1960_s0 + $0x480] sm:$0xff] }
  0x7a   :  { %v815_v51 = vadd.f32 %v814_v34, %v813_v40  ;;  %v155_v34 = vld [vmem:[%s1961_s1 + $0x430] sm:$0xff]  ;;  %v308_v40 = vld [vmem:[%s1960_s0 + $0x448] sm:$0xff]  ;;  %v602_v53 = vmul.f32 %v451_v30, %v451_v30  ;;  %v605_v59 = vmul.f32 %v454_v36, %v454_v36 }
  0x7b   :  { %v679_v61 = vadd.f32 %v678_v50, %v588_v38  ;;  %v826_v38 = vsel %vm702_vm1, %v597_v15, 0.0  ;;  %v160_v50 = vld [vmem:[%s1961_s1 + $0x458] sm:$0xff]  ;;  %v455_v52 = vsub.f32 %v155_v34, %v305_v35  ;;  %v458_v58 = vsub.f32 %v158_v39, %v308_v40  ;;  %v317_v39 = vld [vmem:[%s1960_s0 + $0x490] sm:$0xff] }
  0x7c   :  { %v817_v62 = vadd.f32 %v816_v45, %v815_v51  ;;  %v157_v45 = vld [vmem:[%s1961_s1 + $0x440] sm:$0xff]  ;;  %v310_v51 = vld [vmem:[%s1960_s0 + $0x458] sm:$0xff]  ;;  %v604_v2 = vmul.f32 %v453_v41, %v453_v41  ;;  %v607_v8 = vmul.f32 %v456_v47, %v456_v47 }
  0x7d   :  { %v680_v10 = vadd.f32 %v679_v61, %v590_v49  ;;  %v828_v49 = vsel %vm702_vm1, %v599_v26, 0.0  ;;  %v162_v61 = vld [vmem:[%s1961_s1 + $0x468] sm:$0xff]  ;;  %v457_v63 = vsub.f32 %v157_v45, %v307_v46  ;;  %v460_v7 = vsub.f32 %v160_v50, %v310_v51  ;;  %v319_v50 = vld [vmem:[%s1960_s0 + $0x4a0] sm:$0xff] }
  0x7e   :  { %v819_v11 = vadd.f32 %v818_v56, %v817_v62  ;;  %v159_v56 = vld [vmem:[%s1961_s1 + $0x450] sm:$0xff]  ;;  %v312_v62 = vld [vmem:[%s1960_s0 + $0x468] sm:$0xff]  ;;  %v606_v13 = vmul.f32 %v455_v52, %v455_v52  ;;  %v609_v19 = vmul.f32 %v458_v58, %v458_v58 }
  0x7f   :  { %v681_v21 = vadd.f32 %v680_v10, %v592_v60  ;;  %v830_v60 = vsel %vm702_vm1, %v601_v37, 0.0  ;;  %v164_v10 = vld [vmem:[%s1961_s1 + $0x478] sm:$0xff]  ;;  %v459_v12 = vsub.f32 %v159_v56, %v309_v57  ;;  %v462_v18 = vsub.f32 %v162_v61, %v312_v62 }
  0x80   :  { %v821_v22 = vadd.f32 %v820_v5, %v819_v11  ;;  %v161_v5 = vld [vmem:[%s1961_s1 + $0x460] sm:$0xff]  ;;  %v314_v11 = vld [vmem:[%s1960_s0 + $0x478] sm:$0xff]  ;;  %v608_v24 = vmul.f32 %v457_v63, %v457_v63  ;;  %v611_v30 = vmul.f32 %v460_v7, %v460_v7 }
  0x81   :  { %v682_v32 = vadd.f32 %v681_v21, %v594_v9  ;;  %v832_v9 = vsel %vm702_vm1, %v603_v48, 0.0  ;;  %v166_v21 = vld [vmem:[%s1961_s1 + $0x488] sm:$0xff]  ;;  %v461_v23 = vsub.f32 %v161_v5, %v311_v6  ;;  %v464_v29 = vsub.f32 %v164_v10, %v314_v11 }
  0x82   :  { %v823_v33 = vadd.f32 %v822_v16, %v821_v22  ;;  %v163_v16 = vld [vmem:[%s1961_s1 + $0x470] sm:$0xff]  ;;  %v316_v22 = vld [vmem:[%s1960_s0 + $0x488] sm:$0xff]  ;;  %v610_v35 = vmul.f32 %v459_v12, %v459_v12  ;;  %v613_v41 = vmul.f32 %v462_v18, %v462_v18 }
  0x83   :  { %v683_v43 = vadd.f32 %v682_v32, %v596_v20  ;;  %v834_v20 = vsel %vm702_vm1, %v605_v59, 0.0  ;;  %v168_v32 = vld [vmem:[%s1961_s1 + $0x498] sm:$0xff]  ;;  %v463_v34 = vsub.f32 %v163_v16, %v313_v17  ;;  %v466_v40 = vsub.f32 %v166_v21, %v316_v22 }
  0x84   :  { %v825_v44 = vadd.f32 %v824_v27, %v823_v33  ;;  %v165_v27 = vld [vmem:[%s1961_s1 + $0x480] sm:$0xff]  ;;  %v318_v33 = vld [vmem:[%s1960_s0 + $0x498] sm:$0xff]  ;;  %v612_v46 = vmul.f32 %v461_v23, %v461_v23  ;;  %v615_v52 = vmul.f32 %v464_v29, %v464_v29 }
  0x85   :  { %v684_v54 = vadd.f32 %v683_v43, %v598_v31  ;;  %v836_v31 = vsel %vm702_vm1, %v607_v8, 0.0  ;;  %v170_v43 = vld [vmem:[%s1961_s1 + $0x4a8] sm:$0xff]  ;;  %v465_v45 = vsub.f32 %v165_v27, %v315_v28  ;;  %v468_v51 = vsub.f32 %v168_v32, %v318_v33 }
  0x86   :  { %v827_v55 = vadd.f32 %v826_v38, %v825_v44  ;;  %v167_v38 = vld [vmem:[%s1961_s1 + $0x490] sm:$0xff]  ;;  %v320_v44 = vld [vmem:[%s1960_s0 + $0x4a8] sm:$0xff]  ;;  %v617_v59 = vmul.f32 %v466_v40, %v466_v40  ;;  %v865_v32 = vshrl.u32 %v16_v0, 7  ;;  %s956_s0 = smov [#allocation3]  }
  0x87   :  { %v685_v3 = vadd.f32 %v684_v54, %v600_v42  ;;  %v838_v42 = vsel %vm702_vm1, %v609_v19, 0.0  ;;  %v467_v54 = vsub.f32 %v167_v38, %v317_v39  ;;  %v470_v58 = vsub.f32 %v170_v43, %v320_v44  ;;  %v471_v39 = vld [vmem:[#allocation2] sm:$0x3] }
  0x88   :  { %v829_v4 = vadd.f32 %v828_v49, %v827_v55  ;;  %v169_v49 = vld [vmem:[%s1961_s1 + $0x4a0] sm:$0xff]  ;;  %v614_v55 = vmul.f32 %v463_v34, %v463_v34  ;;  %v616_v62 = vmul.f32 %v465_v45, %v465_v45  ;;  %v893_v43 = vsub.s32 1, %v865_v32  ;;  %s919_s1 = sshll.u32 %s956_s0, 4  ;;  %s920_s1 = int_to_ptr.vmem [resolvable:$true] %s919_s1 }
  0x89   :  { %v686_v14 = vadd.f32 %v685_v3, %v602_v53  ;;  %v840_v53 = vsel %vm702_vm1, %v611_v30, 0.0  ;;  %v469_v61 = vsub.f32 %v169_v49, %v319_v50  ;;  %v619_v3 = vmul.f32 %v468_v51, %v468_v51  ;;  %s932_s22 = scalar_lea.vmem %s920_s1, 128  ;;  %p937_p1 = scmp.lt.s32.totalorder %s920_s1, %s920_s1 }
  0x8a   :  { %v831_v15 = vadd.f32 %v830_v60, %v829_v4  ;;  %v842_v60 = vsel %vm702_vm1, %v613_v41, 0.0  ;;  %v844_v4 = vsel %vm702_vm1, %v615_v52, 0.0  ;;  %v618_v5 = vmul.f32 %v467_v54, %v467_v54  ;;  %p933_p0 = scmp.ne.s32.totalorder %s920_s1, %s932_s22  ;;  %p938_p2 = scmp.lt.s32.totalorder %s932_s22, %s932_s22 }
  0x8b   :  { %v687_v25 = vadd.f32 %v686_v14, %v604_v2  ;;  %v621_v8 = vmul.f32 %v470_v58, %v470_v58  ;;  %v620_v10 = vmul.f32 %v469_v61, %v469_v61 }
  0x8c   :  { %v833_v26 = vadd.f32 %v832_v9, %v831_v15  ;;  %v846_v9 = vsel %vm702_vm1, %v617_v59, 0.0  ;;  %p939_p3 = por %p938_p2, %p937_p1 }
  0x8d   :  { %v688_v36 = vadd.f32 %v687_v25, %v606_v13  ;;  %v848_v13 = vsel %vm702_vm1, %v619_v3, 0.0  ;;  %v850_v16 = vsel %vm702_vm1, %v621_v8, 0.0  ;;  %v955_v25 = vmov 1966171168  }
  0x8e   :  { %v835_v37 = vadd.f32 %v834_v20, %v833_v26  ;;  %v862_v26 = vunpack.c.l.s4 %v955_v25  ;;  %p940_p4 = pnand %p939_p3, %p933_p0 }
  0x8f   :  { %v689_v47 = vadd.f32 %v688_v36, %v608_v24 }
  0x90   :  { %v837_v48 = vadd.f32 %v836_v31, %v835_v37  ;;  %v863_v31 = vunpack.c.0.s8 %v862_v26 }
  0x91   :  { %v690_v56 = vadd.f32 %v689_v47, %v610_v35 }
  0x92   :  { %v839_v57 = vadd.f32 %v838_v42, %v837_v48  ;;  %v866_v36 = vsub.s32 %v863_v31, %v865_v32  ;;  %v889_v42 = vsub.s32 0, %v865_v32 }
  0x93   :  { %v691_v63 = vadd.f32 %v690_v56, %v612_v46 }
  0x94   :  { %v841_v2 = vadd.f32 %v840_v53, %v839_v57 }
  0x95   :  { %v692_v6 = vadd.f32 %v691_v63, %v614_v55 }
  0x96   :  { %v843_v7 = vadd.f32 %v842_v60, %v841_v2 }
  0x97   :  { %v693_v11 = vadd.f32 %v692_v6, %v616_v62 }
  0x98   :  { %v845_v12 = vadd.f32 %v844_v4, %v843_v7 }
  0x99   :  { %v694_v14 = vadd.f32 %v693_v11, %v618_v5 }
  0x9a   :  { %v847_v15 = vadd.f32 %v846_v9, %v845_v12 }
  0x9b   :  { %v695_v17 = vadd.f32 %v694_v14, %v620_v10 }
  0x9c   :  { %v849_v18 = vadd.f32 %v848_v13, %v847_v15 }
  0x9d   :  { %v696_v19 = vrot.slane %v695_v17, 4 }
  0x9e   :  { %v851_v20 = vadd.f32 %v850_v16, %v849_v18 }
  0x9f   :  { %v697_v21 = vadd.f32 %v696_v19, %v695_v17 }
  0xa0   :  { %v852_v22 = vrot.slane %v851_v20, 4 }
  0xa1   :  { %v698_v23 = vrot.slane %v697_v21, 2 }
  0xa2   :  { %v853_v24 = vadd.f32 %v852_v22, %v851_v20 }
  0xa3   :  { %v699_v27 = vadd.f32 %v698_v23, %v697_v21 }
  0xa4   :  { %v854_v28 = vrot.slane %v853_v24, 2 }
  0xa5   :  { %v700_v29 = vrot.slane %v699_v27, 1 }
  0xa6   :  { %v855_v30 = vadd.f32 %v854_v28, %v853_v24 }
  0xa7   :  { %v701_v33 = vadd.f32 %v700_v29, %v699_v27 }
  0xa8   :  { %v856_v34 = vrot.slane %v855_v30, 1 }
  0xaa   :  { %v857_v35 = vadd.f32 %v856_v34, %v855_v30 }
  0xac   :  { %v860_v37 = vcombine.low %v701_v33, %v857_v35 }
  0xae   :  { %v867_v38 = vrot.slane %v860_v37, %v866_v36 }
  0xb0   :  { %v874_v40 = vrot.slane %v867_v38, %v866_v36 }
  0xb2   :  { %v876_v41 = vadd.f32 %v874_v40, %v471_v39 }
  0xb4   :  { %881 = vst.msk [vmem:[#allocation2] sm:$0x3] %vm973_vm0, %v876_v41 }
  0xbb   :  { %v885_v44 = vld [vmem:[#allocation2] sm:$0x3] }
  0xbc   :  { %v890_v45 = vrot.slane %v885_v44, %v889_v42  ;;  %v894_v46 = vrot.slane %v885_v44, %v893_v43 }
  0xbe   :  { %v898_v0 = vsel %vm897_vm2, %v890_v45, 0.0  ;;  %v900_v47 = vsel %vm899_vm3, %v894_v46, 0.0 }
  0xbf   :  { %v901_v48 = vadd.f32 %v900_v47, %v898_v0 }
  0xc1   :  { %902 = vadd.xlane.f32.xlu0 %v901_v48 }
 0x14a   :  { %v903_v49 = vpop.xlane.xlu0 %902 }
 0x14b   :  { %v904_v50 = vrot.slane %v903_v49, 4 }
 0x14d   :  { %v905_v51 = vadd.f32 %v904_v50, %v903_v49 }
 0x14f   :  { %v906_v52 = vrot.slane %v905_v51, 2 }
 0x151   :  { %v907_v53 = vadd.f32 %v906_v52, %v905_v51 }
 0x153   :  { %v908_v54 = vrot.slane %v907_v53, 1 }
 0x155   :  { %v909_v55 = vadd.f32 %v908_v54, %v907_v53 }
 0x157   :  { %927 = vpush %v909_v55 }
 0x188   :  { %s928_s21 = spop %927 }
 0x189   :  { %v911_v1 = vstv %s928_s21 }
 0x18a   :  { %912 = vst [vmem:[#allocation3] sm:$0xff] %v911_v1 }
 0x18b   :  { %943 = shalt.err (!%p940_p4)
}
 0x18c   :  { %922 = dma.vmem_to_hbm [thread:$0]  %s920_s1, 128, %s1962_s2, [#allocation4]  }
 0x18d   :  { %952 = dma.done.wait [#allocation4], 128  }
 0x18e   :  { %953 = vsyncadd [#allocation4], 4294967168 }
 0x18f   :  { %926 = vsyncpa [#allocation4], 1 }

</bundles_post_ra>
